<compile_context>
chip_gen: v7x
topology: tpu7x:2x2x1
jax: 0.10.0
libtpu: 0.0.40
codegen_flags: <defaults>
</compile_context>

<pallas_src>
import jax
import jax.numpy as jnp
from jax.experimental import pallas as pl
from jax.experimental.pallas import tpu as pltpu


def _round_up(n, m):
    return ((n + m - 1) // m) * m


# ---------------------------------------------------------------------------
# Kernels
# ---------------------------------------------------------------------------

def _make_split_kernel(resident):
    """Highway step with separate transform/gate weights (works for any D)."""

    def kernel(x_ref, wh_ref, wg_ref, bh_ref, bg_ref, o_ref, act_ref):
        l = pl.program_id(1)
        wi = l if resident else 0                     # Python-level branch

        @pl.when(l == 0)
        def _():
            act_ref[...] = x_ref[...].astype(jnp.float32)

        x = act_ref[...]                              # (TM, D), f32
        cx = x.astype(wh_ref.dtype)                   # MXU operand dtype
        h = jnp.dot(cx, wh_ref[wi], preferred_element_type=jnp.float32) + bh_ref[wi]
        g = jnp.dot(cx, wg_ref[wi], preferred_element_type=jnp.float32) + bg_ref[wi]
        h = jnp.maximum(h, 0.0)                       # relu (VPU)
        gate = jax.nn.sigmoid(g)                      # sigmoid (EUP slot)
        new_x = h + gate * (x - h)                    # == gate*x + (1-gate)*h
        act_ref[...] = new_x

        @pl.when(l == pl.num_programs(1) - 1)
        def _():
            o_ref[...] = new_x.astype(o_ref.dtype)

    return kernel


def _make_wide_kernel(resident, d):
    """Highway step with fused (D, 2D) weight; requires D % 128 == 0."""

    def kernel(x_ref, w_ref, b_ref, o_ref, act_ref):
        l = pl.program_id(1)
        wi = l if resident else 0

        @pl.when(l == 0)
        def _():
            act_ref[...] = x_ref[...].astype(jnp.float32)

        x = act_ref[...]                              # (TM, D), f32
        z = jnp.dot(x.astype(w_ref.dtype), w_ref[wi],
                    preferred_element_type=jnp.float32) + b_ref[wi]
        h = jnp.maximum(z[:, :d], 0.0)                # static slice at 128-lane boundary
        gate = jax.nn.sigmoid(z[:, d:])
        new_x = h + gate * (x - h)
        act_ref[...] = new_x

        @pl.when(l == pl.num_programs(1) - 1)
        def _():
            o_ref[...] = new_x.astype(o_ref.dtype)

    return kernel


# ---------------------------------------------------------------------------
# Parameter preparation (one-time, outside the per-forward path)
# ---------------------------------------------------------------------------

def prepare_highway_params(weights, biases, *, param_dtype=jnp.float32):
    """weights[i]: (2D, D) PyTorch Linear weight; biases[i]: (2D,).

    Returns ("wide", (w, b)) with w: (L, D, 2D), b: (L, 1, 2D) when D % 128
    == 0 (one MXU pass per layer, h/g split at a 128-lane boundary), otherwise
    ("split", (wh, wg, bh, bg)) with wh/wg: (L, D, D), bh/bg: (L, 1, D).

    param_dtype=jnp.bfloat16 halves weight HBM traffic and doubles MXU
    throughput on every TPU generation (v5e/v6e/v7x all run bf16 natively);
    biases and in-kernel accumulation stay f32.
    """
    d = weights[0].shape[1]
    wh = jnp.stack([jnp.asarray(w)[:d].T for w in weights]).astype(param_dtype)
    wg = jnp.stack([jnp.asarray(w)[d:].T for w in weights]).astype(param_dtype)
    bh = jnp.stack([jnp.asarray(b)[:d].reshape(1, d) for b in biases]).astype(jnp.float32)
    bg = jnp.stack([jnp.asarray(b)[d:].reshape(1, d) for b in biases]).astype(jnp.float32)
    if d % 128 == 0:
        w = jnp.concatenate([wh, wg], axis=2)         # (L, D, 2D): [:D]=h, [D:]=g
        b = jnp.concatenate([bh, bg], axis=2)         # (L, 1, 2D)
        return ("wide", (w, b))
    return ("split", (wh, wg, bh, bg))


# ---------------------------------------------------------------------------
# Forward wrapper
# ---------------------------------------------------------------------------

def _default_vmem_budget():
    """Per-generation scoped-VMEM budget (bytes)."""
    try:
        kind = jax.devices()[0].device_kind.lower()
    except Exception:
        kind = ""
    if "v7" in kind:
        return 48 * 2**20          # v7x: only 64 MiB physical VMEM per TensorCore
    return 64 * 2**20              # v5e / v6e: 128 MiB physical VMEM


def _vmem_bytes(tm, d, num_layers, x_bytes, w_bytes, resident):
    tiles = (2 * tm * d * x_bytes          # x tile (double-buffered)
             + 2 * tm * d * x_bytes        # out tile (double-buffered)
             + tm * d * 4)                 # f32 activation scratch
    if resident:
        # Whole stacked weight + bias blocks (Pallas still allocates 2 buffers).
        w = 2 * (num_layers * 2 * d * d * w_bytes + num_layers * 2 * d * 4)
    else:
        # One layer's Wh+Wg (+ biases), double-buffered per the layer axis.
        w = 2 * (2 * d * d * w_bytes + 2 * d * 4)
    return tiles + w


def highway_forward(x, params, *, tm=None, vmem_budget_bytes=None,
                    weights_resident=None):
    """Applies the fused Highway stack. x: (..., D); params from prepare_highway_params."""
    layout, tensors = params
    *lead, d = x.shape
    x2 = x.reshape(-1, d)
    m = x2.shape[0]

    if layout == "wide":
        w, b = tensors
        num_layers = w.shape[0]
        w_bytes = jnp.dtype(w.dtype).itemsize
    else:
        wh, wg, bh, bg = tensors
        num_layers = wh.shape[0]
        w_bytes = jnp.dtype(wh.dtype).itemsize
    x_bytes = jnp.dtype(x.dtype).itemsize

    budget = vmem_budget_bytes if vmem_budget_bytes is not None else _default_vmem_budget()

    # Hold the whole weight stack in VMEM when it (plus a minimal 128-row tile)
    # fits the budget -> weights leave HBM exactly once per kernel launch.
    if weights_resident is None:
        weights_resident = _vmem_bytes(128, d, num_layers, x_bytes, w_bytes, True) <= budget
    resident = bool(weights_resident)

    # Row tile: 128-aligned (MXU / vreg friendly). When weights must be
    # streamed, use a larger default tile so each weight fetch is amortised
    # over more rows (v6e roofline ~650 flop/byte needs TM >= ~1024).
    if tm is None:
        tm = 512 if resident else 1024
    tm_eff = max(128, min(_round_up(tm, 128), _round_up(m, 128)))
    while tm_eff > 128 and _vmem_bytes(tm_eff, d, num_layers, x_bytes, w_bytes, resident) > budget:
        tm_eff = _round_up(tm_eff // 2, 128)
    # Prefer >= 2 row tiles so dimension_semantics=("parallel", ...) can spread
    # work over both v7x TensorCores.
    while tm_eff > 128 and pl.cdiv(m, tm_eff) < 2:
        tm_eff = _round_up(tm_eff // 2, 128)
    # TODO(synk): if a single layer's streamed Wh/Wg pair alone exceeds the
    # VMEM budget (very large D, especially on v7x), a K/N grid axis with an
    # f32 accumulator is required; not needed at these model sizes.

    m_pad = _round_up(m, tm_eff)
    if m_pad != m:
        x2 = jnp.pad(x2, ((0, m_pad - m), (0, 0)))
    num_row_tiles = m_pad // tm_eff

    est = _vmem_bytes(tm_eff, d, num_layers, x_bytes, w_bytes, resident)
    vmem_limit = int(max(budget, est + 4 * 2**20))    # always enough headroom

    weight_hbm = num_layers * (2 * d * d * w_bytes + 2 * d * 4)
    if not resident:
        weight_hbm *= num_row_tiles                   # streamed weights re-read per row tile
    cost = pl.CostEstimate(
        flops=4 * m_pad * d * d * num_layers,
        transcendentals=m_pad * d * num_layers,
        bytes_accessed=2 * m_pad * d * x_bytes + weight_hbm,
    )

    x_spec = pl.BlockSpec((tm_eff, d), lambda i, l: (i, 0))
    out_spec = pl.BlockSpec((tm_eff, d), lambda i, l: (i, 0))

    if layout == "wide":
        kernel = _make_wide_kernel(resident, d)
        if resident:
            w_specs = [pl.BlockSpec((num_layers, d, 2 * d), lambda i, l: (0, 0, 0)),
                       pl.BlockSpec((num_layers, 1, 2 * d), lambda i, l: (0, 0, 0))]
        else:
            w_specs = [pl.BlockSpec((1, d, 2 * d), lambda i, l: (l, 0, 0)),
                       pl.BlockSpec((1, 1, 2 * d), lambda i, l: (l, 0, 0))]
        operands = (x2, w, b)
    else:
        kernel = _make_split_kernel(resident)
        if resident:
            w_specs = [pl.BlockSpec((num_layers, d, d), lambda i, l: (0, 0, 0)),
                       pl.BlockSpec((num_layers, d, d), lambda i, l: (0, 0, 0)),
                       pl.BlockSpec((num_layers, 1, d), lambda i, l: (0, 0, 0)),
                       pl.BlockSpec((num_layers, 1, d), lambda i, l: (0, 0, 0))]
        else:
            w_specs = [pl.BlockSpec((1, d, d), lambda i, l: (l, 0, 0)),
                       pl.BlockSpec((1, d, d), lambda i, l: (l, 0, 0)),
                       pl.BlockSpec((1, 1, d), lambda i, l: (l, 0, 0)),
                       pl.BlockSpec((1, 1, d), lambda i, l: (l, 0, 0))]
        operands = (x2, wh, wg, bh, bg)

    out = pl.pallas_call(
        kernel,
        out_shape=jax.ShapeDtypeStruct((m_pad, d), x.dtype),
        grid_spec=pltpu.PrefetchScalarGridSpec(
            num_scalar_prefetch=0,
            grid=(num_row_tiles, num_layers),
            in_specs=[x_spec] + w_specs,
            out_specs=out_spec,
            scratch_shapes=[pltpu.VMEM((tm_eff, d), jnp.float32)],
        ),
        compiler_params=pltpu.CompilerParams(
            dimension_semantics=("parallel", "arbitrary"),
            vmem_limit_bytes=vmem_limit),
        cost_estimate=cost,
    )(*operands)

    if m_pad != m:
        out = out[:m]
    return out.reshape(*lead, d)


# ---------------------------------------------------------------------------
# Reference + init
# ---------------------------------------------------------------------------

def highway_reference(x, weights, biases):
    """Pure-JAX reference replicating the PyTorch forward (f32 matmuls)."""
    d = x.shape[-1]
    for w, b in zip(weights, biases):
        z = jnp.dot(x, w.T, precision=jax.lax.Precision.HIGHEST) + b
        h, g = z[..., :d], z[..., d:]
        h = jnp.maximum(h, 0.0)
        gate = jax.nn.sigmoid(g)
        x = gate * x + (1.0 - gate) * h
    return x


def init_highway_params(key, input_dim, layers):
    """Matches Highway.reset_parameters: weight ~ N(0, 0.02), bias = [0s | 1s]."""
    weights, biases = [], []
    for i in range(layers):
        k = jax.random.fold_in(key, i)
        w = 0.02 * jax.random.normal(k, (2 * input_dim, input_dim), jnp.float32)
        b = jnp.concatenate(
            [jnp.zeros((input_dim,), jnp.float32),
             jnp.ones((input_dim,), jnp.float32)])
        weights.append(w)
        biases.append(b)
    return weights, biases


if __name__ == "__main__":
    key = jax.random.PRNGKey(0)
    batch, seq, n_layers = 2, 8, 2

    # Case 1: D=32 (split-weights kernel), resident and streamed weight paths.
    input_dim = 32
    kx, kp = jax.random.split(key)
    x = jax.random.normal(kx, (batch, seq, input_dim), jnp.float32)
    weights, biases = init_highway_params(kp, input_dim, n_layers)
    params = prepare_highway_params(weights, biases)
    ref = highway_reference(x, weights, biases)

    out = jax.block_until_ready(highway_forward(x, params))
    assert out.shape == x.shape
    assert jnp.allclose(out, ref, atol=1e-5, rtol=1e-5), "split/resident mismatch"

    out_s = jax.block_until_ready(highway_forward(x, params, weights_resident=False))
    assert jnp.allclose(out_s, ref, atol=1e-5, rtol=1e-5), "split/streamed mismatch"

    # Case 2: D=128 (fused (D,2D) single-MXU-pass kernel path).
    input_dim2 = 128
    kx2, kp2 = jax.random.split(jax.random.fold_in(key, 1))
    x2 = jax.random.normal(kx2, (batch, seq, input_dim2), jnp.float32)
    weights2, biases2 = init_highway_params(kp2, input_dim2, n_layers)
    params2 = prepare_highway_params(weights2, biases2)
    ref2 = highway_reference(x2, weights2, biases2)

    out2 = jax.block_until_ready(highway_forward(x2, params2))
    assert out2.shape == x2.shape
    assert jnp.allclose(out2, ref2, atol=1e-5, rtol=1e-5), "wide/resident mismatch"

    out2_s = jax.block_until_ready(highway_forward(x2, params2, weights_resident=False))
    assert jnp.allclose(out2_s, ref2, atol=1e-5, rtol=1e-5), "wide/streamed mismatch"

    print("KERNEL_OK")
</pallas_src>

<mosaic_0001>
module attributes {stable_mosaic.version = 11 : i64} {
  func.func @kernel(%arg0: i32, %arg1: i32, %arg2: memref<128x32xf32, #tpu.memory_space<vmem>>, %arg3: memref<2x32x32xf32, #tpu.memory_space<vmem>>, %arg4: memref<2x32x32xf32, #tpu.memory_space<vmem>>, %arg5: memref<2x1x32xf32, #tpu.memory_space<vmem>>, %arg6: memref<2x1x32xf32, #tpu.memory_space<vmem>>, %arg7: memref<128x32xf32, #tpu.memory_space<vmem>>, %arg8: memref<128x32xf32, #tpu.memory_space<vmem>>) attributes {dimension_semantics = [#tpu.dimension_semantics<parallel>, #tpu.dimension_semantics<arbitrary>], iteration_bounds = array<i64: 1, 2>, scalar_prefetch = 0 : i64, scratch_operands = 1 : i64, tpu.core_type = #tpu.core_type<tc>, window_params = [{transform_indices = @transform_0, window_bounds = array<i64: 128, 32>}, {pipeline_mode = #tpu.pipeline_mode<synchronous>, transform_indices = @transform_1, window_bounds = array<i64: 2, 32, 32>}, {pipeline_mode = #tpu.pipeline_mode<synchronous>, transform_indices = @transform_2, window_bounds = array<i64: 2, 32, 32>}, {pipeline_mode = #tpu.pipeline_mode<synchronous>, transform_indices = @transform_3, window_bounds = array<i64: 2, 1, 32>}, {pipeline_mode = #tpu.pipeline_mode<synchronous>, transform_indices = @transform_4, window_bounds = array<i64: 2, 1, 32>}, {transform_indices = @transform_5, window_bounds = array<i64: 128, 32>}]} {
    %c0_i32 = arith.constant 0 : i32
    %0 = arith.cmpi eq, %arg1, %c0_i32 : i32
    %1 = arith.extui %0 : i1 to i32
    %c0_i32_0 = arith.constant 0 : i32
    %2 = arith.cmpi ne, %1, %c0_i32_0 : i32
    scf.if %2 {
      %c0_16 = arith.constant 0 : index
      %c0_17 = arith.constant 0 : index
      %36 = vector.load %arg2[%c0_16, %c0_17] : memref<128x32xf32, #tpu.memory_space<vmem>>, vector<128x32xf32>
      %c0_18 = arith.constant 0 : index
      %c0_19 = arith.constant 0 : index
      %37 = vector.load %arg8[%c0_18, %c0_19] : memref<128x32xf32, #tpu.memory_space<vmem>>, vector<128x32xf32>
      tpu.vector_store %arg8[%c0_18, %c0_19], %36 {strides = array<i32>} : memref<128x32xf32, #tpu.memory_space<vmem>>, vector<128x32xf32>,
    } else {
    }
    %c0 = arith.constant 0 : index
    %c0_1 = arith.constant 0 : index
    %3 = vector.load %arg8[%c0, %c0_1] : memref<128x32xf32, #tpu.memory_space<vmem>>, vector<128x32xf32>
    %4 = arith.index_cast %arg1 : i32 to index
    %c0_2 = arith.constant 0 : index
    %c0_3 = arith.constant 0 : index
    %5 = vector.load %arg3[%4, %c0_2, %c0_3] : memref<2x32x32xf32, #tpu.memory_space<vmem>>, vector<1x32x32xf32>
    %6 = vector.shape_cast %5 : vector<1x32x32xf32> to vector<32x32xf32>
    %cst = arith.constant dense<0.000000e+00> : vector<128x32xf32>
    %7 = tpu.matmul %3, %6, %cst {dimension_numbers = #tpu.dot_dimension_numbers<[1], [0], [0], [1], [0, 0, 1, 1], [], []>} : vector<128x32xf32>, vector<32x32xf32>, vector<128x32xf32> -> vector<128x32xf32>
    %8 = arith.index_cast %arg1 : i32 to index
    %c0_4 = arith.constant 0 : index
    %c0_5 = arith.constant 0 : index
    %9 = vector.load %arg5[%8, %c0_4, %c0_5] : memref<2x1x32xf32, #tpu.memory_space<vmem>>, vector<1x1x32xf32>
    %10 = vector.shape_cast %9 : vector<1x1x32xf32> to vector<1x32xf32>
    %11 = vector.broadcast %10 : vector<1x32xf32> to vector<128x32xf32>
    %12 = arith.addf %7, %11 : vector<128x32xf32>
    %13 = arith.index_cast %arg1 : i32 to index
    %c0_6 = arith.constant 0 : index
    %c0_7 = arith.constant 0 : index
    %14 = vector.load %arg4[%13, %c0_6, %c0_7] : memref<2x32x32xf32, #tpu.memory_space<vmem>>, vector<1x32x32xf32>
    %15 = vector.shape_cast %14 : vector<1x32x32xf32> to vector<32x32xf32>
    %cst_8 = arith.constant dense<0.000000e+00> : vector<128x32xf32>
    %16 = tpu.matmul %3, %15, %cst_8 {dimension_numbers = #tpu.dot_dimension_numbers<[1], [0], [0], [1], [0, 0, 1, 1], [], []>} : vector<128x32xf32>, vector<32x32xf32>, vector<128x32xf32> -> vector<128x32xf32>
    %17 = arith.index_cast %arg1 : i32 to index
    %c0_9 = arith.constant 0 : index
    %c0_10 = arith.constant 0 : index
    %18 = vector.load %arg6[%17, %c0_9, %c0_10] : memref<2x1x32xf32, #tpu.memory_space<vmem>>, vector<1x1x32xf32>
    %19 = vector.shape_cast %18 : vector<1x1x32xf32> to vector<1x32xf32>
    %20 = vector.broadcast %19 : vector<1x32xf32> to vector<128x32xf32>
    %21 = arith.addf %16, %20 : vector<128x32xf32>
    %cst_11 = arith.constant 0.000000e+00 : f32
    %22 = vector.broadcast %cst_11 : f32 to vector<128x32xf32>
    %23 = arith.maximumf %12, %22 : vector<128x32xf32>
    %24 = arith.negf %21 : vector<128x32xf32>
    %25 = math.exp %24 : vector<128x32xf32>
    %cst_12 = arith.constant 1.000000e+00 : f32
    %26 = vector.broadcast %cst_12 : f32 to vector<128x32xf32>
    %27 = arith.addf %26, %25 : vector<128x32xf32>
    %28 = arith.divf %26, %27 : vector<128x32xf32>
    %29 = arith.subf %3, %23 : vector<128x32xf32>
    %30 = arith.mulf %28, %29 : vector<128x32xf32>
    %31 = arith.addf %23, %30 : vector<128x32xf32>
    %c0_13 = arith.constant 0 : index
    %c0_14 = arith.constant 0 : index
    %32 = vector.load %arg8[%c0_13, %c0_14] : memref<128x32xf32, #tpu.memory_space<vmem>>, vector<128x32xf32>
    tpu.vector_store %arg8[%c0_13, %c0_14], %31 {strides = array<i32>} : memref<128x32xf32, #tpu.memory_space<vmem>>, vector<128x32xf32>,
    %c1_i32 = arith.constant 1 : i32
    %33 = arith.cmpi eq, %arg1, %c1_i32 : i32
    %34 = arith.extui %33 : i1 to i32
    %c0_i32_15 = arith.constant 0 : i32
    %35 = arith.cmpi ne, %34, %c0_i32_15 : i32
    scf.if %35 {
      %c0_16 = arith.constant 0 : index
      %c0_17 = arith.constant 0 : index
      %36 = vector.load %arg7[%c0_16, %c0_17] : memref<128x32xf32, #tpu.memory_space<vmem>>, vector<128x32xf32>
      tpu.vector_store %arg7[%c0_16, %c0_17], %31 {strides = array<i32>} : memref<128x32xf32, #tpu.memory_space<vmem>>, vector<128x32xf32>,
    } else {
    }
    return
  }
  func.func @transform_0(%arg0: i32, %arg1: i32) -> (i32, i32) {
    %c0_i32 = arith.constant 0 : i32
    %c0_i32_0 = arith.constant 0 : i32
    return %arg0, %c0_i32 : i32, i32
  }
  func.func @transform_1(%arg0: i32, %arg1: i32) -> (i32, i32, i32) {
    %c0_i32 = arith.constant 0 : i32
    %c0_i32_0 = arith.constant 0 : i32
    %c0_i32_1 = arith.constant 0 : i32
    %c0_i32_2 = arith.constant 0 : i32
    return %c0_i32, %c0_i32_0, %c0_i32_1 : i32, i32, i32
  }
  func.func @transform_2(%arg0: i32, %arg1: i32) -> (i32, i32, i32) {
    %c0_i32 = arith.constant 0 : i32
    %c0_i32_0 = arith.constant 0 : i32
    %c0_i32_1 = arith.constant 0 : i32
    %c0_i32_2 = arith.constant 0 : i32
    return %c0_i32, %c0_i32_0, %c0_i32_1 : i32, i32, i32
  }
  func.func @transform_3(%arg0: i32, %arg1: i32) -> (i32, i32, i32) {
    %c0_i32 = arith.constant 0 : i32
    %c0_i32_0 = arith.constant 0 : i32
    %c0_i32_1 = arith.constant 0 : i32
    %c0_i32_2 = arith.constant 0 : i32
    return %c0_i32, %c0_i32_0, %c0_i32_1 : i32, i32, i32
  }
  func.func @transform_4(%arg0: i32, %arg1: i32) -> (i32, i32, i32) {
    %c0_i32 = arith.constant 0 : i32
    %c0_i32_0 = arith.constant 0 : i32
    %c0_i32_1 = arith.constant 0 : i32
    %c0_i32_2 = arith.constant 0 : i32
    return %c0_i32, %c0_i32_0, %c0_i32_1 : i32, i32, i32
  }
  func.func @transform_5(%arg0: i32, %arg1: i32) -> (i32, i32) {
    %c0_i32 = arith.constant 0 : i32
    %c0_i32_0 = arith.constant 0 : i32
    return %arg0, %c0_i32 : i32, i32
  }
}

</mosaic_0001>

<bundles_post_ra>
// kernel: tpu_custom_call.1
= control target key start
LH: loop header
LB: loop body
LE: loop exit
PB: predicated region body
PF: predicated region fallthrough
CT: control target
= control target key end

     0   :  { %10 = vsyncpa [#allocation4], 0  ;;  %s2114_s0 = inlined_call_operand.hbm [shape: f32[128,32], index: 0, kind: input, shape index: {}]   ;;  %s2115_s1 = inlined_call_operand.hbm [shape: f32[2,32,32], index: 1, kind: input, shape index: {}]   ;;  %s2116_s2 = inlined_call_operand.hbm [shape: f32[2,32,32], index: 2, kind: input, shape index: {}]   ;;  %s2117_s3 = inlined_call_operand.hbm [shape: f32[2,1,32], index: 3, kind: input, shape index: {}]   ;;  %s2118_s4 = inlined_call_operand.hbm [shape: f32[2,1,32], index: 4, kind: input, shape index: {}]   ;;  %s2119_s5 = inlined_call_operand.hbm [shape: f32[128,32], index: 5, kind: output, shape index: {}]  }
   0x1   :  { %11 = vsyncpa [#allocation7], 0 }
   0x2   :  { %12 = vsyncpa [#allocation10], 0 }
   0x3   :  { %13 = vsyncpa [#allocation5], 0  ;;  %s1604_s18 = smov 0   ;;  %s1606_s19 = smov 0  }
   0x4   :  { %s1608_s20 = smov 0  }
   0x5 LB: > { %s1014_s21 = sadd.s32 4294967295, %s1560_s20   ;;  %p1015_p0 = scmp.ge.s32.totalorder %s1560_s20, 1  ;;  %s1560_s20 = sphi %s1608_s20, %s19_s20   ;;  %s1556_s19 = sphi %s1606_s19, %s2131_s19   ;;  %s1552_s18 = sphi %s1604_s18, %s2130_s18  }
   0x6   : > { %p172_p1 = scmp.lt.s32.totalorder %s1560_s20, 3  ;;  %p1624_p2 = scmp.eq.s32.totalorder %s1014_s21, 0 }
   0x7   : > { %s1562_s24 = smov [#allocation6]   ;;  %s1563_s26 = smov [#allocation9]  }
   0x8   : > { %s2123_s22 = scalar_select %p1624_p2, 1, 0 }
   0x9   : > { %p1628_p3 = pnand %p1015_p0, %p172_p1  ;;  %s200_s25 = sshll.u32 %s1562_s24, 4  ;;  %s201_s25 = int_to_ptr.vmem [resolvable:$true] %s200_s25 }
   0xa   : > { %s226_s27 = sshll.u32 %s1563_s26, 4  ;;  %s1356_s6 = scalar_lea.hbm %s2115_s1, 1024  ;;  %s1634_s27 = int_to_ptr.vmem [resolvable:$true] %s226_s27 }
   0xb   : > { %s2124_s23 = scalar_select %p1628_p3, 1, 0 }
   0xc   : > { %p1228_p4 = pneg %p1628_p3  ;;  %p1357_p6 = scmp.ne.s32.totalorder %s2115_s1, %s1356_s6 }
   0xd   : > { %p1363_p10 = scmp.lt.u32.totalorder %s1356_s6, %s2115_s1 }
   0xe   : > { %p1638_p5 = pnand %p1624_p2, %p1228_p4 }
  0x10   : > { %p1650_p7 = pneg %p1638_p5 }
  0x12   : > { %p1359_p8 = pnand %p1650_p7, %p1357_p6 }
  0x14   : > { %p1360_p9 = pneg %p1359_p8 }
  0x16   : > { %p1365_p11 = pnand %p1363_p10, %p1360_p9 }
  0x18   : > { %1368 = shalt.err (!%p1365_p11)
}
  0x19   : > { %s1369_s12 = scalar_lea.vmem %s201_s25, 1024  ;;  %p1377_p1 = scmp.lt.s32.totalorder %s201_s25, %s201_s25 }
  0x1a   : > { %p1370_p12 = scmp.ne.s32.totalorder %s201_s25, %s1369_s12  ;;  %p1378_p4 = scmp.lt.s32.totalorder %s1369_s12, %s1369_s12 }
  0x1c   : > { %p1372_p13 = pnand %p1370_p12, %p1650_p7  ;;  %p1379_p2 = por %p1378_p4, %p1377_p1 }
  0x1e   : > { %p1373_p0 = pneg %p1372_p13 }
  0x20   : > { %p1380_p3 = pnand %p1379_p2, %p1373_p0 }
  0x22   : > { %1383 = shalt.err (!%p1380_p3)
}
  0x23   : > { %s1564_s13 = smov 128   ;;  %s1565_s14 = smov 8  }
  0x24   : > { %1234 = dma.hbm_to_vmem [thread:$0]  (!%p1638_p5), %s2115_s1, 1024, %s201_s25, [#allocation7], %s1564_s13, %s1564_s13, %s1565_s14  }
  0x25   : > { %s1384_s26 = scalar_lea.hbm %s2117_s3, 32 }
  0x26   : > { %p1385_p2 = scmp.ne.s32.totalorder %s2117_s3, %s1384_s26  ;;  %p1391_p8 = scmp.lt.u32.totalorder %s1384_s26, %s2117_s3 }
  0x28   : > { %p1387_p3 = pnand %p1385_p2, %p1650_p7 }
  0x2a   : > { %p1388_p6 = pneg %p1387_p3 }
  0x2c   : > { %p1393_p9 = pnand %p1391_p8, %p1388_p6 }
  0x2e   : > { %1396 = shalt.err (!%p1393_p9)
}
  0x2f   : > { %s1397_s25 = scalar_lea.vmem %s1634_s27, 32  ;;  %p1405_p13 = scmp.lt.s32.totalorder %s1634_s27, %s1634_s27 }
  0x30   : > { %p1398_p10 = scmp.ne.s32.totalorder %s1634_s27, %s1397_s25  ;;  %p1406_p0 = scmp.lt.s32.totalorder %s1397_s25, %s1397_s25 }
  0x32   : > { %p1400_p11 = pnand %p1398_p10, %p1650_p7  ;;  %p1407_p1 = por %p1406_p0, %p1405_p13 }
  0x34   : > { %p1401_p12 = pneg %p1400_p11 }
  0x36   : > { %p1408_p4 = pnand %p1407_p1, %p1401_p12 }
  0x38   : > { %1411 = shalt.err (!%p1408_p4)
}
  0x39   : > { %s1566_s8 = smov 16   ;;  %s1567_s10 = smov 1  }
  0x3a   : > { %1240 = dma.hbm_to_vmem [thread:$0]  (!%p1638_p5), %s2117_s3, 32, %s1634_s27, [#allocation10], %s1566_s8, %s1566_s8, %s1567_s10  }
  0x3b   : > { %s28_s15 = sadd.s32 1, %s1556_s19  ;;  %s1568_s16 = smov [#allocation3]  }
  0x3c   : > { %p29_p2 = scmp.ge.s32.totalorder %s28_s15, 2  ;;  %s187_s17 = sshll.u32 %s1568_s16, 4  ;;  %s188_s17 = int_to_ptr.vmem [resolvable:$true] %s187_s17 }
  0x3d   : > { %s1569_s24 = smov [#allocation8]   ;;  %s1412_s6 = scalar_lea.hbm %s2114_s0, 2048 }
  0x3e   : > { %s2133_s15 = smov (%p29_p2, %s28_s15), 0  ;;  %s213_s26 = sshll.u32 %s1569_s24, 4  ;;  %s214_s26 = int_to_ptr.vmem [resolvable:$true] %s213_s26 }
  0x3f   : > { %p1413_p3 = scmp.ne.s32.totalorder %s2114_s0, %s1412_s6  ;;  %p1419_p9 = scmp.lt.u32.totalorder %s1412_s6, %s2114_s0 }
  0x41   : > { %p1415_p6 = pnand %p1413_p3, %p1650_p7 }
  0x43   : > { %p1416_p8 = pneg %p1415_p6 }
  0x45   : > { %p1421_p10 = pnand %p1419_p9, %p1416_p8 }
  0x47   : > { %1424 = shalt.err (!%p1421_p10)
}
  0x48   : > { %s1425_s12 = scalar_lea.vmem %s188_s17, 2048  ;;  %p1433_p0 = scmp.lt.s32.totalorder %s188_s17, %s188_s17 }
  0x49   : > { %p1426_p11 = scmp.ne.s32.totalorder %s188_s17, %s1425_s12  ;;  %p1434_p1 = scmp.lt.s32.totalorder %s1425_s12, %s1425_s12 }
  0x4b   : > { %p1428_p12 = pnand %p1426_p11, %p1650_p7  ;;  %p1435_p4 = por %p1434_p1, %p1433_p0 }
  0x4d   : > { %p1429_p13 = pneg %p1428_p12 }
  0x4f   : > { %p1436_p2 = pnand %p1435_p4, %p1429_p13 }
  0x51   : > { %1439 = shalt.err (!%p1436_p2)
}
  0x52   : > { %1231 = dma.hbm_to_vmem [thread:$0]  (!%p1638_p5), %s2114_s0, 2048, %s188_s17, [#allocation4], %s1564_s13, %s1564_s13, %s1565_s14  }
  0x53   : > { %s1440_s6 = scalar_lea.hbm %s2116_s2, 1024 }
  0x54   : > { %p1441_p3 = scmp.ne.s32.totalorder %s2116_s2, %s1440_s6  ;;  %p1447_p9 = scmp.lt.u32.totalorder %s1440_s6, %s2116_s2 }
  0x56   : > { %p1443_p6 = pnand %p1441_p3, %p1650_p7 }
  0x58   : > { %p1444_p8 = pneg %p1443_p6 }
  0x5a   : > { %p1449_p10 = pnand %p1447_p9, %p1444_p8 }
  0x5c   : > { %1452 = shalt.err (!%p1449_p10)
}
  0x5d   : > { %s1453_s12 = scalar_lea.vmem %s214_s26, 1024  ;;  %p1461_p0 = scmp.lt.s32.totalorder %s214_s26, %s214_s26 }
  0x5e   : > { %p1454_p11 = scmp.ne.s32.totalorder %s214_s26, %s1453_s12  ;;  %p1462_p1 = scmp.lt.s32.totalorder %s1453_s12, %s1453_s12 }
  0x60   : > { %p1456_p12 = pnand %p1454_p11, %p1650_p7  ;;  %p1463_p4 = por %p1462_p1, %p1461_p0 }
  0x62   : > { %p1457_p13 = pneg %p1456_p12 }
  0x64   : > { %p1464_p2 = pnand %p1463_p4, %p1457_p13 }
  0x66   : > { %1467 = shalt.err (!%p1464_p2)
}
  0x67   : > { %1237 = dma.hbm_to_vmem [thread:$0]  (!%p1638_p5), %s2116_s2, 1024, %s214_s26, [#allocation7], %s1564_s13, %s1564_s13, %s1565_s14  }
  0x68   : > { %s1570_s24 = smov [#allocation11]   ;;  %s1468_s7 = scalar_lea.hbm %s2118_s4, 32 }
  0x69   : > { %s239_s29 = sshll.u32 %s1570_s24, 4  ;;  %p1469_p3 = scmp.ne.s32.totalorder %s2118_s4, %s1468_s7  ;;  %s240_s29 = int_to_ptr.vmem [resolvable:$true] %s239_s29 }
  0x6a   : > { %p1475_p9 = scmp.lt.u32.totalorder %s1468_s7, %s2118_s4 }
  0x6b   : > { %p1471_p6 = pnand %p1469_p3, %p1650_p7 }
  0x6d   : > { %p1472_p8 = pneg %p1471_p6 }
  0x6f   : > { %p1477_p10 = pnand %p1475_p9, %p1472_p8 }
  0x71   : > { %1480 = shalt.err (!%p1477_p10)
}
  0x72   : > { %s1481_s13 = scalar_lea.vmem %s240_s29, 32  ;;  %p1489_p0 = scmp.lt.s32.totalorder %s240_s29, %s240_s29 }
  0x73   : > { %p1482_p11 = scmp.ne.s32.totalorder %s240_s29, %s1481_s13  ;;  %p1490_p1 = scmp.lt.s32.totalorder %s1481_s13, %s1481_s13 }
  0x75   : > { %p1484_p12 = pnand %p1482_p11, %p1650_p7  ;;  %p1491_p4 = por %p1490_p1, %p1489_p0 }
  0x77   : > { %p1485_p13 = pneg %p1484_p12 }
  0x79   : > { %p1492_p2 = pnand %p1491_p4, %p1485_p13 }
  0x7b   : > { %1495 = shalt.err (!%p1492_p2)
}
  0x7c   : > { %1243 = dma.hbm_to_vmem [thread:$0]  (!%p1638_p5), %s2118_s4, 32, %s240_s29, [#allocation10], %s1566_s8, %s1566_s8, %s1567_s10  }
  0x7d   : > { %p2127_p3 = scmp.ne.s32.totalorder %s2124_s23, 0 }
  0x7e   : > { %p2128_p7 = scmp.ne.s32.totalorder (!%p2127_p3), %s2123_s22, 0 }
  0x7f   : > { %255 = sbr.rel (%p2127_p3) target bundleno = 464 (0x1d0), region = 40 }
  0x86   : > { %1535 = dma.done.wait (%p2128_p7), [#allocation4], 2048  }
  0x87   : > { %1537 = vsyncadd (%p2128_p7), [#allocation4], 4294965248 }
  0x88   : > { %1539 = dma.done.wait (%p2128_p7), [#allocation7], 2048  }
  0x89   : > { %1541 = vsyncadd (%p2128_p7), [#allocation7], 4294965248 }
  0x8a   : > { %1543 = dma.done.wait (%p2128_p7), [#allocation10], 64  }
  0x8b   : > { %1545 = vsyncadd (%p2128_p7), [#allocation10], 4294967232  ;;  %p1027_p5 = scmp.ne.s32.totalorder %s1552_s18, 0 }
  0x8c   : > { %v295_v0 = vld [vmem:[#allocation3] sm:$0xff] (!%p1027_p5)  ;;  %vm311_vm0 = vcmask (!%p1027_p5), 261120   ;;  %v296_v1 = vld [vmem:[#allocation3 + $0x8] sm:$0xff] (!%p1027_p5)  ;;  %v297_v2 = vld [vmem:[#allocation3 + $0x10] sm:$0xff] (!%p1027_p5) }
  0x8d   : > { %294 = sbr.rel (%p1027_p5) target bundleno = 149 (0x95), region = 64  ;;  %312 = vst.msk [vmem:[#allocation2] sm:$0xff] (!%p1027_p5), %vm311_vm0, %v295_v0  ;;  %313 = vst.msk [vmem:[#allocation2 + $0x8] sm:$0xff] (!%p1027_p5), %vm311_vm0, %v296_v1  ;;  %v298_v3 = vld [vmem:[#allocation3 + $0x18] sm:$0xff] (!%p1027_p5)  ;;  %v299_v4 = vld [vmem:[#allocation3 + $0x20] sm:$0xff] (!%p1027_p5) }
  0x8e   : > { %314 = vst.msk [vmem:[#allocation2 + $0x10] sm:$0xff] (!%p1027_p5), %vm311_vm0, %v297_v2  ;;  %v300_v5 = vld [vmem:[#allocation3 + $0x28] sm:$0xff] (!%p1027_p5)  ;;  %315 = vst.msk [vmem:[#allocation2 + $0x18] sm:$0xff] (!%p1027_p5), %vm311_vm0, %v298_v3  ;;  %v301_v6 = vld [vmem:[#allocation3 + $0x30] sm:$0xff] (!%p1027_p5) }
  0x8f   : > { %316 = vst.msk [vmem:[#allocation2 + $0x20] sm:$0xff] (!%p1027_p5), %vm311_vm0, %v299_v4  ;;  %317 = vst.msk [vmem:[#allocation2 + $0x28] sm:$0xff] (!%p1027_p5), %vm311_vm0, %v300_v5  ;;  %v302_v7 = vld [vmem:[#allocation3 + $0x38] sm:$0xff] (!%p1027_p5)  ;;  %v303_v8 = vld [vmem:[#allocation3 + $0x40] sm:$0xff] (!%p1027_p5) }
  0x90   : > { %318 = vst.msk [vmem:[#allocation2 + $0x30] sm:$0xff] (!%p1027_p5), %vm311_vm0, %v301_v6  ;;  %319 = vst.msk [vmem:[#allocation2 + $0x38] sm:$0xff] (!%p1027_p5), %vm311_vm0, %v302_v7  ;;  %v304_v9 = vld [vmem:[#allocation3 + $0x48] sm:$0xff] (!%p1027_p5)  ;;  %v305_v10 = vld [vmem:[#allocation3 + $0x50] sm:$0xff] (!%p1027_p5) }
  0x91   : > { %320 = vst.msk [vmem:[#allocation2 + $0x40] sm:$0xff] (!%p1027_p5), %vm311_vm0, %v303_v8  ;;  %v306_v11 = vld [vmem:[#allocation3 + $0x58] sm:$0xff] (!%p1027_p5)  ;;  %321 = vst.msk [vmem:[#allocation2 + $0x48] sm:$0xff] (!%p1027_p5), %vm311_vm0, %v304_v9  ;;  %v307_v12 = vld [vmem:[#allocation3 + $0x60] sm:$0xff] (!%p1027_p5) }
  0x92   : > { %322 = vst.msk [vmem:[#allocation2 + $0x50] sm:$0xff] (!%p1027_p5), %vm311_vm0, %v305_v10  ;;  %323 = vst.msk [vmem:[#allocation2 + $0x58] sm:$0xff] (!%p1027_p5), %vm311_vm0, %v306_v11  ;;  %v308_v13 = vld [vmem:[#allocation3 + $0x68] sm:$0xff] (!%p1027_p5)  ;;  %v309_v14 = vld [vmem:[#allocation3 + $0x70] sm:$0xff] (!%p1027_p5) }
  0x93   : > { %324 = vst.msk [vmem:[#allocation2 + $0x60] sm:$0xff] (!%p1027_p5), %vm311_vm0, %v307_v12  ;;  %325 = vst.msk [vmem:[#allocation2 + $0x68] sm:$0xff] (!%p1027_p5), %vm311_vm0, %v308_v13  ;;  %v310_v15 = vld [vmem:[#allocation3 + $0x78] sm:$0xff] (!%p1027_p5) }
  0x94   : > { %326 = vst.msk [vmem:[#allocation2 + $0x70] sm:$0xff] %vm311_vm0, %v309_v14  ;;  %327 = vst.msk [vmem:[#allocation2 + $0x78] sm:$0xff] %vm311_vm0, %v310_v15 }
  0x95 PF: > { %s1028_s22 = sshll.u32 %s1552_s18, 5  ;;  %v1793_v16 = vld [vmem:[#allocation2] sm:$0xff]  ;;  %vm358_vm1 = vcmask 261120   ;;  %v1799_v29 = vld [vmem:[#allocation2 + $0x8] sm:$0xff]  ;;  %s557_s9 = scalar_lea.vmem [#allocation11], %s1552_s18 }
  0x96   : > { %1164 = vmatprep.mubr.msk.f32.mxu1 %vm358_vm1, %v1793_v16  ;;  %1132 = vmatprep.mubr.msk.f32.mxu0 %vm358_vm1, %v1793_v16  ;;  %s552_s23 = scalar_lea.vmem [#allocation8], %s1028_s22  ;;  %s345_s28 = scalar_lea.vmem [#allocation6], %s1028_s22  ;;  %v1801_v30 = vld [vmem:[#allocation2 + $0x10] sm:$0xff]  ;;  %v1807_v31 = vld [vmem:[#allocation2 + $0x18] sm:$0xff]  ;;  %v1890_v44 = vld [vmem:[%s557_s9] ss:$0 sm:$0xff] }
  0x97   : > { %v553_v17 = vld [vmem:[%s552_s23] sm:$0xff]  ;;  %v554_v18 = vld [vmem:[%s552_s23 + $0x8] sm:$0xff]  ;;  %v555_v19 = vld [vmem:[%s552_s23 + $0x10] sm:$0xff]  ;;  %s350_s8 = scalar_lea.vmem [#allocation9], %s1552_s18  ;;  %p1079_p6 = scmp.ne.s32.totalorder %s1552_s18, 1 }
  0x98   : > { %v1196_v20 = vpack.c.bf16 %v554_v18, %v553_v17  ;;  %v556_v21 = vld [vmem:[%s552_s23 + $0x18] sm:$0xff]  ;;  %v346_v23 = vld [vmem:[%s345_s28] sm:$0xff]  ;;  %v347_v24 = vld [vmem:[%s345_s28 + $0x8] sm:$0xff] }
  0x99   : > { %v1200_v22 = vpack.c.bf16 %v556_v21, %v555_v19  ;;  %v1188_v25 = vpack.c.bf16 %v347_v24, %v346_v23  ;;  %v348_v26 = vld [vmem:[%s345_s28 + $0x10] sm:$0xff]  ;;  %v349_v27 = vld [vmem:[%s345_s28 + $0x18] sm:$0xff]  ;;  %v1809_v32 = vld [vmem:[#allocation2 + $0x20] sm:$0xff] }
  0x9a   : > { %1197 = vmatprep.subr.bf16.mxu1 %v1196_v20  ;;  %v1192_v28 = vpack.c.bf16 %v349_v27, %v348_v26  ;;  %v1819_v33 = vld [vmem:[#allocation2 + $0x28] sm:$0xff]  ;;  %v1821_v34 = vld [vmem:[#allocation2 + $0x30] sm:$0xff]  ;;  %v1831_v35 = vld [vmem:[#allocation2 + $0x38] sm:$0xff] }
  0x9b   : > { %1199 = vmatpush3.bf16.msra.mxu1 %v1196_v20  ;;  %1189 = vmatprep.subr.bf16.mxu0 %v1188_v25  ;;  %v1833_v36 = vld [vmem:[#allocation2 + $0x40] sm:$0xff]  ;;  %v1843_v37 = vld [vmem:[#allocation2 + $0x48] sm:$0xff]  ;;  %v1845_v38 = vld [vmem:[#allocation2 + $0x50] sm:$0xff] }
  0x9c   : > { %1201 = vmatprep.subr.bf16.mxu1 %v1200_v22  ;;  %1191 = vmatpush3.bf16.msra.mxu0 %v1188_v25  ;;  %v1855_v39 = vld [vmem:[#allocation2 + $0x58] sm:$0xff]  ;;  %v1857_v40 = vld [vmem:[#allocation2 + $0x60] sm:$0xff]  ;;  %v1867_v41 = vld [vmem:[#allocation2 + $0x68] sm:$0xff] }
  0x9d   : > { %1193 = vmatprep.subr.bf16.mxu0 %v1192_v28  ;;  %v1869_v42 = vld [vmem:[#allocation2 + $0x70] sm:$0xff]  ;;  %v1879_v43 = vld [vmem:[#allocation2 + $0x78] sm:$0xff]  ;;  %v1900_v8 = vld [vmem:[%s350_s8] ss:$0 sm:$0xff] }
  0x9f   : > { %1203 = vmatpush3.bf16.msra.mxu1 %v1200_v22 }
  0xa0   : > { %1195 = vmatpush3.bf16.msra.mxu0 %v1192_v28 }
  0xa2   : > { %1165 = vmatmul.mubr.msk.f32.vlgmr.msra.gmra.mrb[0].mxu1 %vm358_vm1, %v1799_v29 }
  0xa3   : > { %1167 = vmatprep.mubr.msk.f32.mxu1 %vm358_vm1, %v1801_v30  ;;  %1133 = vmatmul.mubr.msk.f32.vlgmr.msra.gmra.mrb[0].mxu0 %vm358_vm1, %v1799_v29 }
  0xa4   : > { %1135 = vmatprep.mubr.msk.f32.mxu0 %vm358_vm1, %v1801_v30 }
  0xa6   : > { %1168 = vmatmul.mubr.msk.f32.gmra.mrb[2].mxu1 %vm358_vm1, %v1807_v31 }
  0xa7   : > { %1170 = vmatprep.mubr.msk.f32.mxu1 %vm358_vm1, %v1809_v32  ;;  %1136 = vmatmul.mubr.msk.f32.gmra.mrb[2].mxu0 %vm358_vm1, %v1807_v31 }
  0xa8   : > { %1138 = vmatprep.mubr.msk.f32.mxu0 %vm358_vm1, %v1809_v32 }
  0xaa   : > { %1171 = vmatmul.mubr.msk.f32.gmra.mrb[4].mxu1 %vm358_vm1, %v1819_v33 }
  0xab   : > { %1173 = vmatprep.mubr.msk.f32.mxu1 %vm358_vm1, %v1821_v34  ;;  %1139 = vmatmul.mubr.msk.f32.gmra.mrb[4].mxu0 %vm358_vm1, %v1819_v33 }
  0xac   : > { %1141 = vmatprep.mubr.msk.f32.mxu0 %vm358_vm1, %v1821_v34 }
  0xae   : > { %1174 = vmatmul.mubr.msk.f32.gmra.mrb[6].mxu1 %vm358_vm1, %v1831_v35 }
  0xaf   : > { %1176 = vmatprep.mubr.msk.f32.mxu1 %vm358_vm1, %v1833_v36  ;;  %1142 = vmatmul.mubr.msk.f32.gmra.mrb[6].mxu0 %vm358_vm1, %v1831_v35 }
  0xb0   : > { %1144 = vmatprep.mubr.msk.f32.mxu0 %vm358_vm1, %v1833_v36 }
  0xb2   : > { %1177 = vmatmul.mubr.msk.f32.gmra.mrb[8].mxu1 %vm358_vm1, %v1843_v37 }
  0xb3   : > { %1179 = vmatprep.mubr.msk.f32.mxu1 %vm358_vm1, %v1845_v38  ;;  %1145 = vmatmul.mubr.msk.f32.gmra.mrb[8].mxu0 %vm358_vm1, %v1843_v37 }
  0xb4   : > { %1147 = vmatprep.mubr.msk.f32.mxu0 %vm358_vm1, %v1845_v38 }
  0xb6   : > { %1180 = vmatmul.mubr.msk.f32.gmra.mrb[10].mxu1 %vm358_vm1, %v1855_v39 }
  0xb7   : > { %1182 = vmatprep.mubr.msk.f32.mxu1 %vm358_vm1, %v1857_v40  ;;  %1148 = vmatmul.mubr.msk.f32.gmra.mrb[10].mxu0 %vm358_vm1, %v1855_v39 }
  0xb8   : > { %1150 = vmatprep.mubr.msk.f32.mxu0 %vm358_vm1, %v1857_v40 }
  0xba   : > { %1183 = vmatmul.mubr.msk.f32.gmra.mrb[12].mxu1 %vm358_vm1, %v1867_v41 }
  0xbb   : > { %1185 = vmatprep.mubr.msk.f32.mxu1 %vm358_vm1, %v1869_v42  ;;  %1151 = vmatmul.mubr.msk.f32.gmra.mrb[12].mxu0 %vm358_vm1, %v1867_v41 }
  0xbc   : > { %1153 = vmatprep.mubr.msk.f32.mxu0 %vm358_vm1, %v1869_v42 }
  0xbe   : > { %1186 = vmatmul.mubr.msk.f32.gmra.mrb[14].mxu1 %vm358_vm1, %v1879_v43 }
  0xbf   : > { %1154 = vmatmul.mubr.msk.f32.gmra.mrb[14].mxu0 %vm358_vm1, %v1879_v43 }
 0x175   : > { %v1166_v45 = vpop.f32.mrb[0].mxu1 }
 0x176   : > { %v637_v46 = vadd.f32 %v1166_v45, %v1890_v44  ;;  %v631_v47 = vpop.f32.mrb[1].mxu1  ;;  %v1134_v49 = vpop.f32.mrb[0].mxu0 }
 0x177   : > { %v632_v48 = vadd.f32 %v1890_v44, %v631_v47  ;;  %v473_v51 = vpop.f32.mrb[1].mxu0  ;;  %v1908_v19 = vadd.f32 %v1134_v49, %v1900_v8 }
 0x178   : > { %v1064_v50 = vmul.f32 -1.442695, %v637_v46  ;;  %v1912_v23 = vadd.f32 %v1900_v8, %v473_v51 }
 0x179   : > { %v1063_v52 = vmul.f32 -1.442695, %v632_v48  ;;  %v1169_v53 = vpop.f32.mrb[2].mxu1  ;;  %v711_v51 = vmax.f32 %v1908_v19, 0.0 }
 0x17a   : > { %1292 = vpow2.f32 %v1064_v50  ;;  %v647_v54 = vadd.f32 %v1169_v53, %v1890_v44  ;;  %v641_v55 = vpop.f32.mrb[3].mxu1  ;;  %v1137_v57 = vpop.f32.mrb[2].mxu0 }
 0x17b   : > { %1294 = vpow2.f32 %v1063_v52  ;;  %v642_v56 = vadd.f32 %v1890_v44, %v641_v55  ;;  %v483_v59 = vpop.f32.mrb[3].mxu0  ;;  %v1916_v25 = vadd.f32 %v1137_v57, %v1900_v8  ;;  %v710_v55 = vmax.f32 %v1912_v23, 0.0 }
 0x17c   : > { %v1066_v58 = vmul.f32 -1.442695, %v647_v54  ;;  %v1919_v26 = vadd.f32 %v1900_v8, %v483_v59 }
 0x17d   : > { %v1065_v60 = vmul.f32 -1.442695, %v642_v56  ;;  %v1172_v61 = vpop.f32.mrb[4].mxu1  ;;  %v713_v57 = vmax.f32 %v1916_v25, 0.0 }
 0x17e   : > { %1296 = vpow2.f32 %v1066_v58  ;;  %v657_v62 = vadd.f32 %v1172_v61, %v1890_v44  ;;  %v651_v63 = vpop.f32.mrb[5].mxu1  ;;  %v1140_v1 = vpop.f32.mrb[4].mxu0  ;;  %v712_v58 = vmax.f32 %v1919_v26, 0.0 }
 0x17f   : > { %1298 = vpow2.f32 %v1065_v60  ;;  %v652_v0 = vadd.f32 %v1890_v44, %v651_v63  ;;  %v493_v3 = vpop.f32.mrb[5].mxu0 }
 0x180   : > { %v1068_v2 = vmul.f32 -1.442695, %v657_v62  ;;  %v1934_v62 = vadd.f32 %v1140_v1, %v1900_v8  ;;  %v1937_v63 = vadd.f32 %v1900_v8, %v493_v3  ;;  %v825_v3 = vsub.f32 %v1807_v31, %v713_v57 }
 0x181   : > { %v1067_v4 = vmul.f32 -1.442695, %v652_v0  ;;  %v1175_v5 = vpop.f32.mrb[6].mxu1 }
 0x182   : > { %1300 = vpow2.f32 %v1068_v2  ;;  %v667_v6 = vadd.f32 %v1175_v5, %v1890_v44  ;;  %v661_v7 = vpop.f32.mrb[7].mxu1  ;;  %v1903_v10 = vpop.f32.mrb[6].mxu0  ;;  %v823_v5 = vsub.f32 %v1799_v29, %v711_v51  ;;  %v824_v29 = vsub.f32 %v1801_v30, %v712_v58 }
 0x183   : > { %1302 = vpow2.f32 %v1067_v4  ;;  %v662_v9 = vadd.f32 %v1890_v44, %v661_v7  ;;  %v1905_v13 = vpop.f32.mrb[7].mxu0  ;;  %v714_v19 = vmax.f32 %v1937_v63, 0.0 }
 0x184   : > { %v1293_v11 = vpop.eup %1292  ;;  %v1070_v12 = vmul.f32 -1.442695, %v667_v6 }
 0x185   : > { %v1295_v14 = vpop.eup %1294  ;;  %v775_v15 = vadd.f32 1.0, %v1293_v11  ;;  %v1069_v17 = vmul.f32 -1.442695, %v662_v9  ;;  %v1178_v18 = vpop.f32.mrb[8].mxu1  ;;  %v822_v11 = vsub.f32 %v1793_v16, %v710_v55  ;;  %v715_v16 = vmax.f32 %v1934_v62, 0.0 }
 0x186   : > { %v774_v20 = vadd.f32 1.0, %v1295_v14  ;;  %1304 = vpow2.f32 %v1070_v12  ;;  %v677_v21 = vadd.f32 %v1178_v18, %v1890_v44  ;;  %v671_v22 = vpop.f32.mrb[9].mxu1  ;;  %v1921_v27 = vpop.f32.mrb[8].mxu0 }
 0x187   : > { %1306 = vrcp.f32 %v775_v15  ;;  %v672_v24 = vadd.f32 %v1890_v44, %v671_v22  ;;  %v1923_v46 = vpop.f32.mrb[9].mxu0 }
 0x188   : > { %v1297_v28 = vpop.eup %1296  ;;  %1308 = vrcp.f32 %v774_v20  ;;  %v1072_v45 = vmul.f32 -1.442695, %v677_v21 }
 0x189   : > { %v1299_v47 = vpop.eup %1298  ;;  %v777_v48 = vadd.f32 1.0, %v1297_v28  ;;  %1310 = vpow2.f32 %v1069_v17  ;;  %v1071_v49 = vmul.f32 -1.442695, %v672_v24  ;;  %v1181_v50 = vpop.f32.mrb[10].mxu1  ;;  %v1959_v24 = vadd.f32 %v1903_v10, %v1900_v8 }
 0x18a   : > { %v776_v52 = vadd.f32 1.0, %v1299_v47  ;;  %1312 = vpow2.f32 %v1072_v45  ;;  %v687_v53 = vadd.f32 %v1181_v50, %v1890_v44  ;;  %v681_v54 = vpop.f32.mrb[11].mxu1  ;;  %v1931_v59 = vpop.f32.mrb[10].mxu0 }
 0x18b   : > { %1314 = vrcp.f32 %v777_v48  ;;  %v682_v56 = vadd.f32 %v1890_v44, %v681_v54  ;;  %v1939_v0 = vpop.f32.mrb[11].mxu0  ;;  %v1964_v48 = vadd.f32 %v1900_v8, %v1905_v13 }
 0x18c   : > { %v1301_v60 = vpop.eup %1300  ;;  %1316 = vrcp.f32 %v776_v52  ;;  %v1074_v61 = vmul.f32 -1.442695, %v687_v53  ;;  %v1969_v53 = vadd.f32 %v1921_v27, %v1900_v8 }
 0x18d   : > { %v1303_v2 = vpop.eup %1302  ;;  %v779_v4 = vadd.f32 1.0, %v1301_v60  ;;  %1318 = vpow2.f32 %v1071_v49  ;;  %v1073_v6 = vmul.f32 -1.442695, %v682_v56  ;;  %v1184_v7 = vpop.f32.mrb[12].mxu1 }
 0x18e   : > { %v778_v9 = vadd.f32 1.0, %v1303_v2  ;;  %1320 = vpow2.f32 %v1074_v61  ;;  %v697_v12 = vadd.f32 %v1184_v7, %v1890_v44  ;;  %v691_v1 = vpop.f32.mrb[13].mxu1  ;;  %v1951_v15 = vpop.f32.mrb[12].mxu0  ;;  %v717_v7 = vmax.f32 %v1959_v24, 0.0 }
 0x18f   : > { %1322 = vrcp.f32 %v779_v4  ;;  %v692_v14 = vadd.f32 %v1890_v44, %v691_v1  ;;  %v1955_v20 = vpop.f32.mrb[13].mxu0 }
 0x190   : > { %v1305_v17 = vpop.eup %1304  ;;  %1324 = vrcp.f32 %v778_v9  ;;  %v1076_v18 = vmul.f32 -1.442695, %v697_v12  ;;  %v716_v12 = vmax.f32 %v1964_v48, 0.0 }
 0x191   : > { %v1307_v21 = vpop.eup %1306  ;;  %v781_v22 = vadd.f32 1.0, %v1305_v17  ;;  %1326 = vpow2.f32 %v1073_v6  ;;  %v1075_v31 = vmul.f32 -1.442695, %v692_v14  ;;  %v1187_v23 = vpop.f32.mrb[14].mxu1 }
 0x192   : > { %v1309_v30 = vpop.eup %1308  ;;  %v839_v28 = vmul.f32 %v1307_v21, %v823_v5  ;;  %1328 = vpow2.f32 %v1076_v18  ;;  %v707_v45 = vadd.f32 %v1187_v23, %v1890_v44  ;;  %v701_v47 = vpop.f32.mrb[15].mxu1  ;;  %v828_v24 = vsub.f32 %v1821_v34, %v716_v12 }
 0x193   : > { %v1311_v49 = vpop.eup %1310  ;;  %1330 = vrcp.f32 %v781_v22  ;;  %v838_v50 = vmul.f32 %v1309_v30, %v822_v11  ;;  %v702_v52 = vadd.f32 %v1890_v44, %v701_v47  ;;  %v1971_v10 = vpop.f32.mrb[14].mxu0  ;;  %v826_v11 = vsub.f32 %v1809_v32, %v714_v19 }
 0x194   : > { %v1313_v54 = vpop.eup %1312  ;;  %v780_v56 = vadd.f32 1.0, %v1311_v49  ;;  %v1973_v60 = vadd.f32 %v839_v28, %v711_v51  ;;  %1332 = vpow2.f32 %v1075_v31  ;;  %v1078_v61 = vmul.f32 -1.442695, %v707_v45  ;;  %v1975_v2 = vpop.f32.mrb[15].mxu0 }
 0x195   : > { %v1315_v13 = vpop.eup %1314  ;;  %v783_v4 = vadd.f32 1.0, %v1313_v54  ;;  %v1977_v5 = vadd.f32 %v838_v50, %v710_v55  ;;  %v1077_v6 = vmul.f32 -1.442695, %v702_v52  ;;  %v827_v51 = vsub.f32 %v1819_v33, %v715_v16 }
 0x196   : > { %v1317_v44 = vpop.eup %1316  ;;  %1334 = vrcp.f32 %v780_v56  ;;  %871 = vst.msk [vmem:[#allocation2 + $0x8] sm:$0xff] %vm358_vm1, %v1973_v60  ;;  %v841_v27 = vmul.f32 %v1315_v13, %v825_v3  ;;  %v719_v33 = vmax.f32 %v1969_v53, 0.0  ;;  %v514_v32 = vadd.f32 %v1900_v8, %v1923_v46  ;;  %891 = vst.msk [vmem:[#allocation12 + $0x8] sm:$0xff] (!%p1079_p6), %vm358_vm1, %v1973_v60 }
 0x197   : > { %v1319_v9 = vpop.eup %1318  ;;  %1336 = vrcp.f32 %v783_v4  ;;  %870 = vst.msk [vmem:[#allocation2] sm:$0xff] %vm358_vm1, %v1977_v5  ;;  %v840_v55 = vmul.f32 %v1317_v44, %v824_v29  ;;  %v529_v22 = vadd.f32 %v1931_v59, %v1900_v8  ;;  %v524_v47 = vadd.f32 %v1900_v8, %v1939_v0  ;;  %890 = vst.msk [vmem:[#allocation12] sm:$0xff] (!%p1079_p6), %vm358_vm1, %v1977_v5 }
 0x198   : > { %v1321_v1 = vpop.eup %1320  ;;  %v782_v3 = vadd.f32 1.0, %v1319_v9  ;;  %v1993_v14 = vadd.f32 %v841_v27, %v713_v57  ;;  %1338 = vpow2.f32 %v1078_v61  ;;  %v829_v57 = vsub.f32 %v1831_v35, %v717_v7 }
 0x199   : > { %v1323_v17 = vpop.eup %1322  ;;  %v785_v18 = vadd.f32 1.0, %v1321_v1  ;;  %v1998_v29 = vadd.f32 %v840_v55, %v712_v58  ;;  %1340 = vpow2.f32 %v1077_v6  ;;  %v831_v30 = vsub.f32 %v1843_v37, %v719_v33 }
 0x19a   : > { %v1325_v21 = vpop.eup %1324  ;;  %1342 = vrcp.f32 %v782_v3  ;;  %873 = vst.msk [vmem:[#allocation2 + $0x18] sm:$0xff] %vm358_vm1, %v1993_v14  ;;  %v843_v25 = vmul.f32 %v1323_v17, %v827_v51  ;;  %v718_v45 = vmax.f32 %v514_v32, 0.0  ;;  %v539_v34 = vadd.f32 %v1951_v15, %v1900_v8  ;;  %893 = vst.msk [vmem:[#allocation12 + $0x18] sm:$0xff] (!%p1079_p6), %vm358_vm1, %v1993_v14 }
 0x19b   : > { %v1327_v31 = vpop.eup %1326  ;;  %1344 = vrcp.f32 %v785_v18  ;;  %872 = vst.msk [vmem:[#allocation2 + $0x10] sm:$0xff] %vm358_vm1, %v1998_v29  ;;  %v842_v26 = vmul.f32 %v1325_v21, %v826_v11  ;;  %v534_v0 = vadd.f32 %v1900_v8, %v1955_v20  ;;  %v720_v53 = vmax.f32 %v524_v47, 0.0  ;;  %892 = vst.msk [vmem:[#allocation12 + $0x10] sm:$0xff] (!%p1079_p6), %vm358_vm1, %v1998_v29 }
 0x19c   : > { %v1329_v58 = vpop.eup %1328  ;;  %v784_v23 = vadd.f32 1.0, %v1327_v31  ;;  %v2011_v46 = vadd.f32 %v843_v25, %v715_v16  ;;  %v721_v16 = vmax.f32 %v529_v22, 0.0  ;;  %v830_v52 = vsub.f32 %v1833_v36, %v718_v45 }
 0x19d   : > { %v1331_v35 = vpop.eup %1330  ;;  %v787_v28 = vadd.f32 1.0, %v1329_v58  ;;  %v2017_v59 = vadd.f32 %v842_v26, %v714_v19  ;;  %v723_v61 = vmax.f32 %v539_v34, 0.0  ;;  %v722_v51 = vmax.f32 %v534_v0, 0.0 }
 0x19e   : > { %v1333_v48 = vpop.eup %1332  ;;  %1346 = vrcp.f32 %v784_v23  ;;  %875 = vst.msk [vmem:[#allocation2 + $0x28] sm:$0xff] %vm358_vm1, %v2011_v46  ;;  %v845_v62 = vmul.f32 %v1331_v35, %v829_v57  ;;  %v833_v56 = vsub.f32 %v1855_v39, %v721_v16  ;;  %v832_v55 = vsub.f32 %v1845_v38, %v720_v53  ;;  %895 = vst.msk [vmem:[#allocation12 + $0x28] sm:$0xff] (!%p1079_p6), %vm358_vm1, %v2011_v46 }
 0x19f   : > { %1348 = vrcp.f32 %v787_v28  ;;  %v786_v37 = vadd.f32 1.0, %v1333_v48  ;;  %874 = vst.msk [vmem:[#allocation2 + $0x20] sm:$0xff] %vm358_vm1, %v2017_v59  ;;  %v544_v39 = vadd.f32 %v1900_v8, %v1975_v2  ;;  %894 = vst.msk [vmem:[#allocation12 + $0x20] sm:$0xff] (!%p1079_p6), %vm358_vm1, %v2017_v59 }
 0x1a0   : > { %v1335_v63 = vpop.eup %1334  ;;  %v2027_v19 = vadd.f32 %v845_v62, %v717_v7  ;;  %v549_v7 = vadd.f32 %v1971_v10, %v1900_v8  ;;  %v834_v10 = vsub.f32 %v1857_v40, %v722_v51 }
 0x1a1   : > { %v1337_v49 = vpop.eup %1336  ;;  %1350 = vrcp.f32 %v786_v37  ;;  %v844_v50 = vmul.f32 %v1335_v63, %v828_v24  ;;  %v724_v38 = vmax.f32 %v544_v39, 0.0 }
 0x1a2   : > { %v1339_v54 = vpop.eup %1338  ;;  %877 = vst.msk [vmem:[#allocation2 + $0x38] sm:$0xff] %vm358_vm1, %v2027_v19  ;;  %v847_v15 = vmul.f32 %v1337_v49, %v831_v30  ;;  %v725_v17 = vmax.f32 %v549_v7, 0.0  ;;  %897 = vst.msk [vmem:[#allocation12 + $0x38] sm:$0xff] (!%p1079_p6), %vm358_vm1, %v2027_v19 }
 0x1a3   : > { %v1341_v13 = vpop.eup %1340  ;;  %v789_v4 = vadd.f32 1.0, %v1339_v54  ;;  %v860_v6 = vadd.f32 %v844_v50, %v716_v12  ;;  %v835_v12 = vsub.f32 %v1867_v41, %v723_v61  ;;  %v836_v22 = vsub.f32 %v1869_v42, %v724_v38 }
 0x1a4   : > { %v1343_v44 = vpop.eup %1342  ;;  %v788_v27 = vadd.f32 1.0, %v1341_v13  ;;  %v863_v20 = vadd.f32 %v847_v15, %v719_v33  ;;  %v837_v41 = vsub.f32 %v1879_v43, %v725_v17 }
 0x1a5   : > { %v1345_v36 = vpop.eup %1344  ;;  %1352 = vrcp.f32 %v789_v4  ;;  %876 = vst.msk [vmem:[#allocation2 + $0x30] sm:$0xff] %vm358_vm1, %v860_v6  ;;  %v846_v9 = vmul.f32 %v1343_v44, %v830_v52  ;;  %896 = vst.msk [vmem:[#allocation12 + $0x30] sm:$0xff] (!%p1079_p6), %vm358_vm1, %v860_v6 }
 0x1a6   : > { %1354 = vrcp.f32 %v788_v27  ;;  %879 = vst.msk [vmem:[#allocation2 + $0x48] sm:$0xff] %vm358_vm1, %v863_v20  ;;  %v849_v11 = vmul.f32 %v1345_v36, %v833_v56  ;;  %899 = vst.msk [vmem:[#allocation12 + $0x48] sm:$0xff] (!%p1079_p6), %vm358_vm1, %v863_v20 }
 0x1a7   : > { %v862_v1 = vadd.f32 %v846_v9, %v718_v45 }
 0x1a8   : > { %v1347_v3 = vpop.eup %1346  ;;  %v865_v33 = vadd.f32 %v849_v11, %v721_v16 }
 0x1a9   : > { %v1349_v18 = vpop.eup %1348  ;;  %878 = vst.msk [vmem:[#allocation2 + $0x40] sm:$0xff] %vm358_vm1, %v862_v1  ;;  %v848_v32 = vmul.f32 %v1347_v3, %v832_v55  ;;  %898 = vst.msk [vmem:[#allocation12 + $0x40] sm:$0xff] (!%p1079_p6), %vm358_vm1, %v862_v1 }
 0x1aa   : > { %881 = vst.msk [vmem:[#allocation2 + $0x58] sm:$0xff] %vm358_vm1, %v865_v33  ;;  %v851_v8 = vmul.f32 %v1349_v18, %v835_v12  ;;  %901 = vst.msk [vmem:[#allocation12 + $0x58] sm:$0xff] (!%p1079_p6), %vm358_vm1, %v865_v33 }
 0x1ab   : > { %v1351_v2 = vpop.eup %1350  ;;  %v864_v21 = vadd.f32 %v848_v32, %v720_v53 }
 0x1ac   : > { %v867_v25 = vadd.f32 %v851_v8, %v723_v61  ;;  %v850_v57 = vmul.f32 %v1351_v2, %v834_v10 }
 0x1ad   : > { %880 = vst.msk [vmem:[#allocation2 + $0x50] sm:$0xff] %vm358_vm1, %v864_v21  ;;  %900 = vst.msk [vmem:[#allocation12 + $0x50] sm:$0xff] (!%p1079_p6), %vm358_vm1, %v864_v21 }
 0x1ae   : > { %883 = vst.msk [vmem:[#allocation2 + $0x68] sm:$0xff] %vm358_vm1, %v867_v25  ;;  %v866_v40 = vadd.f32 %v850_v57, %v722_v51  ;;  %903 = vst.msk [vmem:[#allocation12 + $0x68] sm:$0xff] (!%p1079_p6), %vm358_vm1, %v867_v25 }
 0x1af   : > { %v1353_v31 = vpop.eup %1352  ;;  %889 = sbr.rel (%p1079_p6) target bundleno = 438 (0x1b6), region = 68 }
 0x1b0   : > { %v1355_v26 = vpop.eup %1354  ;;  %882 = vst.msk [vmem:[#allocation2 + $0x60] sm:$0xff] %vm358_vm1, %v866_v40  ;;  %v853_v58 = vmul.f32 %v1353_v31, %v837_v41  ;;  %902 = vst.msk [vmem:[#allocation12 + $0x60] sm:$0xff] (!%p1079_p6), %vm358_vm1, %v866_v40 }
 0x1b1   : > { %v852_v23 = vmul.f32 %v1355_v26, %v836_v22 }
 0x1b2   : > { %v869_v24 = vadd.f32 %v853_v58, %v725_v17 }
 0x1b3   : > { %v868_v30 = vadd.f32 %v852_v23, %v724_v38 }
 0x1b4   : > { %885 = vst.msk [vmem:[#allocation2 + $0x78] sm:$0xff] %vm358_vm1, %v869_v24  ;;  %905 = vst.msk [vmem:[#allocation12 + $0x78] sm:$0xff] (!%p1079_p6), %vm358_vm1, %v869_v24 }
 0x1b5   : > { %884 = vst.msk [vmem:[#allocation2 + $0x70] sm:$0xff] %vm358_vm1, %v868_v30  ;;  %904 = vst.msk [vmem:[#allocation12 + $0x70] sm:$0xff] (!%p1079_p6), %vm358_vm1, %v868_v30 }
 0x1b6 PF: > { %p2079_p8 = scmp.eq.s32.totalorder %s1014_s21, 1  ;;  %s1571_s10 = smov [#allocation12]  }
 0x1b7   : > { %s915_s17 = sshll.u32 %s1571_s10, 4  ;;  %s916_s17 = int_to_ptr.vmem [resolvable:$true] %s915_s17 }
 0x1b8   : > { %s1496_s16 = scalar_lea.vmem %s916_s17, 2048  ;;  %p1503_p12 = scmp.lt.s32.totalorder %s916_s17, %s916_s17 }
 0x1b9   : > { %p1497_p9 = scmp.ne.s32.totalorder %s916_s17, %s1496_s16  ;;  %p1504_p13 = scmp.lt.s32.totalorder %s1496_s16, %s1496_s16 }
 0x1bb   : > { %p1498_p10 = pnand %p1497_p9, %p2079_p8  ;;  %p1505_p0 = por %p1504_p13, %p1503_p12 }
 0x1bd   : > { %p1499_p11 = pneg %p1498_p10 }
 0x1bf   : > { %p1506_p1 = pnand %p1505_p0, %p1499_p11 }
 0x1c1   : > { %1509 = shalt.err (!%p1506_p1)
}
 0x1c2   : > { %s1510_s21 = scalar_lea.hbm %s2119_s5, 2048 }
 0x1c3   : > { %p1511_p4 = scmp.ne.s32.totalorder %s2119_s5, %s1510_s21  ;;  %p1516_p7 = scmp.lt.u32.totalorder %s1510_s21, %s2119_s5 }
 0x1c5   : > { %p1512_p2 = pnand %p1511_p4, %p2079_p8 }
 0x1c7   : > { %p1513_p3 = pneg %p1512_p2 }
 0x1c9   : > { %p1518_p5 = pnand %p1516_p7, %p1513_p3 }
 0x1cb   : > { %1521 = shalt.err (!%p1518_p5)
}
 0x1cc   : > { %s1572_s27 = smov 128   ;;  %s1573_s11 = smov 8  }
 0x1cd   : > { %1225 = dma.vmem_to_hbm [thread:$0]  (%p2079_p8), %s916_s17, 2048, %s2119_s5, [#allocation5], %s1572_s27, %s1572_s27, %s1573_s11  }
 0x1ce   : > { %1547 = dma.done.wait (%p2079_p8), [#allocation5], 2048  }
 0x1cf   : > { %1549 = vsyncadd (%p2079_p8), [#allocation5], 4294965248 }
 0x1d0 PF: > { %s19_s20 = sadd.s32 1, %s1560_s20   ;;  %s2130_s18 = smov %s1556_s19 }
 0x1d1   : > { %p16_p6 = scmp.ge.s32.totalorder %s19_s20, 4   ;;  %s2131_s19 = smov %s2133_s15 }
 0x1d3   :  { %18 = sbr.rel (!%p16_p6) target bundleno = 5 (0x5), region = 99 }
 0x1da   :  { %931 = vsyncpa [#allocation4], 1 }
 0x1db   :  { %933 = vsyncpa [#allocation4 + $0x1], 1 }
 0x1dc   :  { %934 = vsyncpa [#allocation7], 1 }
 0x1dd   :  { %935 = vsyncpa [#allocation10], 1 }
 0x1de   :  { %936 = vsyncpa [#allocation5], 1 }
 0x1df   :  { %938 = vsyncpa [#allocation5 + $0x1], 1 }

</bundles_post_ra>
